<compile_context>
chip_gen: v6e
topology: v6e:2x2x1
jax: 0.10.0
libtpu: 0.0.40
codegen_flags: <defaults>
</compile_context>

<pallas_src>
import functools

import jax
import jax.numpy as jnp
from jax import lax
from jax.experimental import pallas as pl
from jax.experimental.pallas import tpu as pltpu

_MAX_BLOCK_BYTES = 4 * 1024 * 1024  # per-step input bytes (x2 for double buffering)


def _dice_kernel(x_ref, t_ref, out_ref, *, h, hr, ragged):
    # x_ref:   (1, 2, hr, w)  logits, channels 0 and 1 only
    # t_ref:   (1, hr, w)     target mask (any dtype)
    # out_ref: (1, 1, 2, w)   sublane 0: 2*(pred*t).sum(rows); sublane 1: (pred+t).sum(rows)
    x0 = x_ref[0, 0]
    x1 = x_ref[0, 1]

    # softmax(x)[1] > softmax(x)[0]  <=>  x1 > x0  (exp is strictly monotonic)
    pred = (x1 > x0).astype(jnp.float32)          # (hr, w)
    t = t_ref[0].astype(jnp.float32)              # (hr, w)

    if ragged:
        # Last spatial tile overruns h: zero out the invalid rows.
        k = pl.program_id(1)
        valid = h - k * hr                        # scalar (>= hr for full tiles)
        row = lax.broadcasted_iota(jnp.int32, pred.shape, 0)
        m = row < valid
        pred = jnp.where(m, pred, 0.0)
        t = jnp.where(m, t, 0.0)

    inter = 2.0 * jnp.sum(pred * t, axis=0, keepdims=True)   # (1, w)
    sets = jnp.sum(pred + t, axis=0, keepdims=True)          # (1, w)
    out_ref[0, 0, 0:1, :] = inter
    out_ref[0, 0, 1:2, :] = sets


def dice_loss(logits_nchw: jax.Array, target_nhw: jax.Array,
              epsilon: float = 1e-6) -> jax.Array:
    n, c, h, w = logits_nchw.shape
    assert c >= 2, "binary DiceLoss compares channel 1 vs channel 0 (needs c >= 2)"
    assert target_nhw.shape == (n, h, w)

    if target_nhw.dtype == jnp.bool_:
        target_nhw = target_nhw.astype(jnp.uint8)

    # Row-tile sizing: keep one step's inputs (2 logit channels + target rows)
    # under ~4 MiB -> ~8 MiB double-buffered, safe on v5e/v6e/v7x defaults.
    bytes_per_row = w * (2 * logits_nchw.dtype.itemsize + target_nhw.dtype.itemsize)
    hr_cap = max(8, ((_MAX_BLOCK_BYTES // bytes_per_row) // 8) * 8)
    hr = h if h <= hr_cap else hr_cap             # full h, or a multiple of 8

    # v7x megacore heuristic: with a single image, ensure >= 2 spatial tiles so
    # both TensorCores stream HBM (harmless one extra step on v5e/v6e).
    if n == 1 and h >= 16:
        half8 = (((h + 1) // 2 + 7) // 8) * 8
        if half8 < h:
            hr = min(hr, half8)

    num_k = pl.cdiv(h, hr)
    ragged = (h % hr) != 0

    kernel = functools.partial(_dice_kernel, h=h, hr=hr, ragged=ragged)
    partials = pl.pallas_call(
        kernel,
        out_shape=jax.ShapeDtypeStruct((n, num_k, 2, w), jnp.float32),
        grid=(n, num_k),
        in_specs=[
            # channel dim is an untiled leading dim: block of 2 at block-index 0
            pl.BlockSpec((1, 2, hr, w), lambda i, k: (i, 0, k, 0)),
            pl.BlockSpec((1, hr, w), lambda i, k: (i, k, 0)),
        ],
        out_specs=pl.BlockSpec((1, 1, 2, w), lambda i, k: (i, k, 0, 0)),
        compiler_params=pltpu.CompilerParams(
            dimension_semantics=("parallel", "parallel")),
    )(logits_nchw, target_nhw)

    inter2 = jnp.sum(partials[:, :, 0, :], axis=(1, 2))   # (n,)  == 2 * intersection
    sets = jnp.sum(partials[:, :, 1, :], axis=(1, 2))     # (n,)  == mask.sum + target.sum

    # torch.where(sets_sum == 0, inter, sets_sum), eps-division, mean over batch
    sets = jnp.where(sets == 0.0, inter2, sets)
    dice = (inter2 + epsilon) / (sets + epsilon)
    return 1.0 - jnp.mean(dice)


def _dice_loss_ref(logits_nchw, target_nhw, epsilon=1e-6):
    # Pure-JAX reference mirroring the PyTorch forward (binary path).
    n, c, h, w = logits_nchw.shape
    x = jnp.transpose(logits_nchw, (0, 2, 3, 1)).reshape(n, -1, c)
    p = jax.nn.softmax(x, axis=-1)
    mask = (p[..., 1] > p[..., 0]).astype(jnp.float32).reshape(n, h, w)
    t = target_nhw.astype(jnp.float32)
    inter = 2.0 * jnp.sum(mask * t, axis=(-1, -2))
    sets = jnp.sum(mask, axis=(-1, -2)) + jnp.sum(t, axis=(-1, -2))
    sets = jnp.where(sets == 0.0, inter, sets)
    dice = (inter + epsilon) / (sets + epsilon)
    return 1.0 - jnp.mean(dice)


if __name__ == "__main__":
    key = jax.random.PRNGKey(0)
    k1, k2, k3, k4 = jax.random.split(key, 4)

    # Test 1: small even shapes, float32 target (batch axis feeds the grid).
    n, c, h, w = 2, 4, 16, 16
    logits = jax.random.normal(k1, (n, c, h, w), dtype=jnp.float32)
    target = (jax.random.uniform(k2, (n, h, w)) > 0.5).astype(jnp.float32)
    loss = jax.block_until_ready(dice_loss(logits, target))
    ref = jax.block_until_ready(_dice_loss_ref(logits, target))
    assert jnp.allclose(loss, ref, atol=1e-5, rtol=1e-5), (loss, ref)

    # Test 2: n=1 with ragged spatial tiles + uint8 target (exercises the
    # in-kernel tail mask, the n==1 tile split, and the low-precision target path).
    n2, c2, h2, w2 = 1, 3, 72, 40
    logits2 = jax.random.normal(k3, (n2, c2, h2, w2), dtype=jnp.float32)
    target2 = (jax.random.uniform(k4, (n2, h2, w2)) > 0.5).astype(jnp.uint8)
    loss2 = jax.block_until_ready(dice_loss(logits2, target2))
    ref2 = jax.block_until_ready(_dice_loss_ref(logits2, target2.astype(jnp.float32)))
    assert jnp.allclose(loss2, ref2, atol=1e-5, rtol=1e-5), (loss2, ref2)

    print("KERNEL_OK")
</pallas_src>

<mosaic_0001>
module attributes {stable_mosaic.version = 11 : i64} {
  func.func @_dice_kernel(%arg0: i32, %arg1: i32, %arg2: memref<1x2x16x16xf32, #tpu.memory_space<vmem>>, %arg3: memref<1x16x16xf32, #tpu.memory_space<vmem>>, %arg4: memref<1x1x2x16xf32, #tpu.memory_space<vmem>>) attributes {dimension_semantics = [#tpu.dimension_semantics<parallel>, #tpu.dimension_semantics<parallel>], iteration_bounds = array<i64: 2, 1>, scalar_prefetch = 0 : i64, scratch_operands = 0 : i64, tpu.core_type = #tpu.core_type<tc>, window_params = [{transform_indices = @transform_0, window_bounds = array<i64: 1, 2, 16, 16>}, {transform_indices = @transform_1, window_bounds = array<i64: 1, 16, 16>}, {transform_indices = @transform_2, window_bounds = array<i64: 1, 1, 2, 16>}]} {
    %c0 = arith.constant 0 : index
    %c0_0 = arith.constant 0 : index
    %c0_1 = arith.constant 0 : index
    %c0_2 = arith.constant 0 : index
    %0 = vector.load %arg2[%c0, %c0_0, %c0_1, %c0_2] : memref<1x2x16x16xf32, #tpu.memory_space<vmem>>, vector<1x1x16x16xf32>
    %1 = vector.shape_cast %0 : vector<1x1x16x16xf32> to vector<16x16xf32>
    %c0_3 = arith.constant 0 : index
    %c1 = arith.constant 1 : index
    %c0_4 = arith.constant 0 : index
    %c0_5 = arith.constant 0 : index
    %2 = vector.load %arg2[%c0_3, %c1, %c0_4, %c0_5] : memref<1x2x16x16xf32, #tpu.memory_space<vmem>>, vector<1x1x16x16xf32>
    %3 = vector.shape_cast %2 : vector<1x1x16x16xf32> to vector<16x16xf32>
    %4 = arith.cmpf ogt, %3, %1 : vector<16x16xf32>
    %5 = arith.extui %4 : vector<16x16xi1> to vector<16x16xi32>
    %6 = arith.sitofp %5 : vector<16x16xi32> to vector<16x16xf32>
    %c0_6 = arith.constant 0 : index
    %c0_7 = arith.constant 0 : index
    %c0_8 = arith.constant 0 : index
    %7 = vector.load %arg3[%c0_6, %c0_7, %c0_8] : memref<1x16x16xf32, #tpu.memory_space<vmem>>, vector<1x16x16xf32>
    %8 = vector.shape_cast %7 : vector<1x16x16xf32> to vector<16x16xf32>
    %9 = arith.mulf %6, %8 : vector<16x16xf32>
    %cst = arith.constant dense<0.000000e+00> : vector<16xf32>
    %10 = vector.multi_reduction <add>, %9, %cst [0] : vector<16x16xf32> to vector<16xf32>
    %11 = vector.shape_cast %10 : vector<16xf32> to vector<1x16xf32>
    %cst_9 = arith.constant 2.000000e+00 : f32
    %12 = vector.broadcast %cst_9 : f32 to vector<1x16xf32>
    %13 = arith.mulf %12, %11 : vector<1x16xf32>
    %14 = arith.addf %6, %8 : vector<16x16xf32>
    %cst_10 = arith.constant dense<0.000000e+00> : vector<16xf32>
    %15 = vector.multi_reduction <add>, %14, %cst_10 [0] : vector<16x16xf32> to vector<16xf32>
    %16 = vector.shape_cast %15 : vector<16xf32> to vector<1x16xf32>
    %c0_11 = arith.constant 0 : index
    %c0_12 = arith.constant 0 : index
    %c0_13 = arith.constant 0 : index
    %c0_14 = arith.constant 0 : index
    %17 = vector.load %arg4[%c0_11, %c0_12, %c0_13, %c0_14] : memref<1x1x2x16xf32, #tpu.memory_space<vmem>>, vector<1x1x1x16xf32>
    %18 = vector.shape_cast %17 : vector<1x1x1x16xf32> to vector<1x16xf32>
    %19 = vector.shape_cast %13 : vector<1x16xf32> to vector<1x1x1x16xf32>
    tpu.vector_store %arg4[%c0_11, %c0_12, %c0_13, %c0_14], %19 {strides = array<i32>} : memref<1x1x2x16xf32, #tpu.memory_space<vmem>>, vector<1x1x1x16xf32>,
    %c0_15 = arith.constant 0 : index
    %c0_16 = arith.constant 0 : index
    %c1_17 = arith.constant 1 : index
    %c0_18 = arith.constant 0 : index
    %20 = vector.load %arg4[%c0_15, %c0_16, %c1_17, %c0_18] : memref<1x1x2x16xf32, #tpu.memory_space<vmem>>, vector<1x1x1x16xf32>
    %21 = vector.shape_cast %20 : vector<1x1x1x16xf32> to vector<1x16xf32>
    %22 = vector.shape_cast %16 : vector<1x16xf32> to vector<1x1x1x16xf32>
    tpu.vector_store %arg4[%c0_15, %c0_16, %c1_17, %c0_18], %22 {strides = array<i32>} : memref<1x1x2x16xf32, #tpu.memory_space<vmem>>, vector<1x1x1x16xf32>,
    return
  }
  func.func @transform_0(%arg0: i32, %arg1: i32) -> (i32, i32, i32, i32) {
    %c0_i32 = arith.constant 0 : i32
    %c0_i32_0 = arith.constant 0 : i32
    %c0_i32_1 = arith.constant 0 : i32
    return %arg0, %c0_i32, %arg1, %c0_i32_0 : i32, i32, i32, i32
  }
  func.func @transform_1(%arg0: i32, %arg1: i32) -> (i32, i32, i32) {
    %c0_i32 = arith.constant 0 : i32
    %c0_i32_0 = arith.constant 0 : i32
    return %arg0, %arg1, %c0_i32 : i32, i32, i32
  }
  func.func @transform_2(%arg0: i32, %arg1: i32) -> (i32, i32, i32, i32) {
    %c0_i32 = arith.constant 0 : i32
    %c0_i32_0 = arith.constant 0 : i32
    %c0_i32_1 = arith.constant 0 : i32
    return %arg0, %arg1, %c0_i32, %c0_i32_0 : i32, i32, i32, i32
  }
}

</mosaic_0001>

<bundles_post_ra>
// kernel: tpu_custom_call.1
= control target key start
LH: loop header
LB: loop body
LE: loop exit
PB: predicated region body
PF: predicated region fallthrough
CT: control target
= control target key end

     0   :  { %7 = vsyncpa [#allocation3], 0  ;;  %s815_s0 = inlined_call_operand.hbm [shape: f32[2,4,16,16], index: 0, kind: input, shape index: {}]   ;;  %s816_s1 = inlined_call_operand.hbm [shape: f32[2,16,16], index: 1, kind: input, shape index: {}]   ;;  %s817_s2 = inlined_call_operand.hbm [shape: f32[2,1,2,16], index: 2, kind: output, shape index: {}]  }
   0x1   :  { %9 = vsyncpa [#allocation3 + $0x1], 0 }
   0x2   :  { %10 = vsyncpa [#allocation6], 0 }
   0x3   :  { %12 = vsyncpa [#allocation6 + $0x1], 0 }
   0x4   :  { %13 = vsyncpa [#allocation4], 0 }
   0x5   :  { %15 = vsyncpa [#allocation4 + $0x1], 0  ;;  %s646_s9 = smov 0   ;;  %s648_s10 = smov 0  }
   0x6   :  { %s650_s11 = smov 0   ;;  %s652_s12 = smov 0  }
   0x7   :  { %s654_s13 = smov 0   ;;  %s656_s14 = smov 0  }
   0x8 LB: > { %s389_s15 = sadd.s32 4294967295, %s623_s14   ;;  %s390_s16 = sadd.s32 4294967294, %s623_s14   ;;  %s623_s14 = sphi %s656_s14, %s21_s14   ;;  %s619_s13 = sphi %s654_s13, %s829_s13   ;;  %s615_s12 = sphi %s652_s12, %s828_s12   ;;  %s611_s11 = sphi %s650_s11, %s827_s11   ;;  %s607_s10 = sphi %s648_s10, %s826_s10   ;;  %s603_s9 = sphi %s646_s9, %s825_s9  }
   0x9   : > { %s33_s17 = sadd.s32 1, %s619_s13  ;;  %s42_s18 = sadd.s32 1, %s611_s11 }
   0xa   : > { %p35_p0 = scmp.ge.s32.totalorder %s33_s17, 2  ;;  %p49_p1 = scmp.ne.s32.totalorder %s611_s11, %s607_s10 }
   0xb   : > { %p50_p2 = scmp.eq.s32.totalorder %s623_s14, 0  ;;  %p55_p3 = scmp.ne.s32.totalorder %s607_s10, %s603_s9 }
   0xc   : > { %s831_s17 = smov (%p35_p0, %s33_s17), 0  ;;  %p56_p5 = scmp.eq.s32.totalorder %s389_s15, 0 }
   0xd   : > { %p687_p4 = por %p50_p2, %p49_p1  ;;  %s37_s20 = ssub.s32 %s619_s13, %s831_s17 }
   0xe   : > { %p109_p6 = scmp.eq.s32.totalorder %s389_s15, 1  ;;  %p40_p7 = scmp.eq.s32.totalorder %s37_s20, 0 }
   0xf   : > { %p693_p8 = por %p56_p5, %p55_p3  ;;  %p115_p10 = scmp.eq.s32.totalorder %s390_s16, 1 }
  0x10   : > { %p697_p9 = por %p109_p6, %p49_p1  ;;  %p430_p13 = scmp.lt.s32.totalorder %s623_s14, 2 }
  0x11   : > { %s702_s23 = scalar_select %p40_p7, %s611_s11, %s42_s18  }
  0x12   : > { %p704_p11 = por %p115_p10, %p55_p3  ;;  %s711_s25 = sand.u32 1, %s611_s11  }
  0x13   : > { %s393_s26 = sshll.u32 %s711_s25, 5  ;;  %s411_s27 = sshll.u32 %s619_s13, 10 }
  0x14   : > { %s147_s30 = scalar_lea.hbm %s815_s0, %s411_s27  ;;  %s139_s3 = scalar_lea.vmem [#allocation2], %s393_s26 }
  0x15   : > { %s148_s4 = sshll.u32 %s139_s3, 4  ;;  %p720_p0 = pnand %p430_p13, %p687_p4  ;;  %s149_s4 = int_to_ptr.vmem [resolvable:$true] %s148_s4 }
  0x16   : > { %p399_p1 = scmp.ge.s32.totalorder %s623_s14, 1  ;;  %s136_s6 = scalar_lea.sflag [#allocation3], %s711_s25 }
  0x17   : > { %p485_p2 = pneg %p720_p0  ;;  %s496_s7 = scalar_lea.vmem %s149_s4, 512 }
  0x18   : > { %p497_p3 = scmp.ne.s32.totalorder %s149_s4, %s496_s7  ;;  %s625_s8 = smov [#allocation2]  }
  0x19   : > { %s501_s15 = sshll.u32 %s625_s8, 4  ;;  %s502_s15 = int_to_ptr.vmem [resolvable:$false] %s501_s15 }
  0x1a   : > { %p499_p5 = pnand %p497_p3, %p485_p2  ;;  %s503_s16 = scalar_lea.vmem %s502_s15, 1024 }
  0x1b   : > { %p504_p4 = scmp.lt.s32.totalorder %s149_s4, %s502_s15  ;;  %p505_p7 = scmp.lt.s32.totalorder %s503_s16, %s496_s7 }
  0x1c   : > { %p500_p6 = pneg %p499_p5 }
  0x1d   : > { %p506_p10 = por %p505_p7, %p504_p4 }
  0x1f   : > { %p507_p13 = pnand %p506_p10, %p500_p6 }
  0x21   : > { %510 = shalt.err (!%p507_p13)
}
  0x22   : > { %s626_s18 = smov 128   ;;  %s627_s19 = smov 8  }
  0x23   : > { %422 = dma.hbm_to_vmem [thread:$0]  (!%p720_p0), %s147_s30, 512, %s149_s4, %s136_s6, %s626_s18, %s626_s18, %s627_s19  }
  0x24   : > { %p179_p3 = scmp.lt.s32.totalorder %s623_s14, 3  ;;  %s396_s20 = sshll.u32 %s711_s25, 4 }
  0x25   : > { %s412_s26 = sshll.u32 %s619_s13, 8  ;;  %s162_s7 = scalar_lea.vmem [#allocation5], %s396_s20 }
  0x26   : > { %p738_p5 = pnand %p399_p1, %p179_p3  ;;  %s170_s3 = scalar_lea.hbm %s816_s1, %s412_s26 }
  0x27   : > { %s171_s8 = sshll.u32 %s162_s7, 4  ;;  %s159_s15 = scalar_lea.sflag [#allocation6], %s711_s25  ;;  %s172_s8 = int_to_ptr.vmem [resolvable:$true] %s171_s8 }
  0x28   : > { %s524_s16 = scalar_lea.vmem %s172_s8, 256  ;;  %s628_s30 = smov [#allocation5]  }
  0x29   : > { %p525_p6 = scmp.ne.s32.totalorder %s172_s8, %s524_s16  ;;  %s529_s4 = sshll.u32 %s628_s30, 4  ;;  %s530_s4 = int_to_ptr.vmem [resolvable:$false] %s529_s4 }
  0x2a   : > { %s531_s6 = scalar_lea.vmem %s530_s4, 512  ;;  %p532_p1 = scmp.lt.s32.totalorder %s172_s8, %s530_s4 }
  0x2b   : > { %p527_p4 = pnand %p525_p6, %p485_p2  ;;  %p533_p10 = scmp.lt.s32.totalorder %s531_s6, %s524_s16 }
  0x2d   : > { %p528_p7 = pneg %p527_p4  ;;  %p534_p13 = por %p533_p10, %p532_p1 }
  0x2f   : > { %p535_p3 = pnand %p534_p13, %p528_p7 }
  0x31   : > { %538 = shalt.err (!%p535_p3)
}
  0x32   : > { %425 = dma.hbm_to_vmem [thread:$0]  (!%p720_p0), %s170_s3, 256, %s172_s8, %s159_s15, %s626_s18, %s626_s18, %s627_s19  }
  0x33   : > { %183 = sbr.rel (%p738_p5) target bundleno = 96 (0x60), region = 28  ;;  %s754_s25 = sand.u32 (!%p738_p5), 1, %s607_s10  }
  0x34   : > { %s400_s20 = sshll.u32 (!%p738_p5), %s754_s25, 5  ;;  %s186_s26 = scalar_lea.sflag (!%p738_p5), [#allocation3], %s754_s25 }
  0x35   : > { %s189_s28 = scalar_lea.vmem (!%p738_p5), [#allocation2], %s400_s20 }
  0x38   : > { %590 = dma.done.wait (%p693_p8), %s186_s26, 512  }
  0x39   : > { %592 = vsyncadd (%p693_p8), %s186_s26, 4294966784  ;;  %s401_s5 = sshll.u32 %s754_s25, 4  ;;  %s195_s18 = scalar_lea.sflag [#allocation6], %s754_s25 }
  0x3a   : > { %s198_s19 = scalar_lea.vmem [#allocation5], %s401_s5 }
  0x3b   : > { %594 = dma.done.wait (%p693_p8), %s195_s18, 256  }
  0x3c   : > { %596 = vsyncadd (%p693_p8), %s195_s18, 4294967040  ;;  %v226_v0 = vld [vmem:[%s189_s28] sm:$0xff]  ;;  %v227_v1 = vld [vmem:[%s189_s28 + $0x8] sm:$0xff]  ;;  %v629_v6 = vmov 0.0   ;;  %vm241_vm2 = vcmask 130048   ;;  %s402_s21 = sshll.u32 %s754_s25, 1 }
  0x3d   : > { %v403_v2 = vld [vmem:[%s189_s28 + $0x10] sm:$0xff]  ;;  %v404_v3 = vld [vmem:[%s189_s28 + $0x18] sm:$0xff]  ;;  %vm263_vm3 = vcmask 122880   ;;  %s223_s27 = scalar_lea.vmem [#allocation7], %s402_s21  ;;  %s408_s3 = sshll.u32 %s615_s12, 5 }
  0x3e   : > { %vm231_vm0 = vcmp.gt.f32.partialorder %v403_v2, %v226_v0  ;;  %v237_v4 = vld [vmem:[%s198_s19] sm:$0xff]  ;;  %v238_v5 = vld [vmem:[%s198_s19 + $0x8] sm:$0xff]  ;;  %vm232_vm1 = vcmp.gt.f32.partialorder %v404_v3, %v227_v1  ;;  %s281_s29 = sshll.u32 %s223_s27, 4  ;;  %s279_s15 = scalar_lea.hbm %s817_s2, %s408_s3  ;;  %s770_s29 = int_to_ptr.vmem [resolvable:$true] %s281_s29 }
  0x3f   : > { %v405_v7 = vsel %vm231_vm0, 1.0, %v629_v6  ;;  %v406_v8 = vsel %vm232_vm1, 1.0, %v629_v6  ;;  %s267_s16 = scalar_lea.sflag [#allocation4], %s754_s25  ;;  %s539_s30 = scalar_lea.vmem %s770_s29, 32 }
  0x40   : > { %v239_v9 = vmul.f32 %v405_v7, %v237_v4  ;;  %v252_v10 = vadd.f32 %v405_v7, %v237_v4  ;;  %v240_v11 = vmul.f32 %v406_v8, %v238_v5  ;;  %v253_v12 = vadd.f32 %v406_v8, %v238_v5  ;;  %p540_p8 = scmp.ne.s32.totalorder %s770_s29, %s539_s30  ;;  %s630_s12 = smov [#allocation7]  }
  0x41   : > { %s543_s4 = sshll.u32 %s630_s12, 4  ;;  %s544_s4 = int_to_ptr.vmem [resolvable:$false] %s543_s4 }
  0x42   : > { %v242_v13 = vsel %vm241_vm2, %v239_v9, 0.0  ;;  %v254_v14 = vsel %vm241_vm2, %v252_v10, 0.0  ;;  %v243_v15 = vsel %vm241_vm2, %v240_v11, 0.0  ;;  %v255_v16 = vsel %vm241_vm2, %v253_v12, 0.0  ;;  %p541_p0 = pnand %p540_p8, %p697_p9  ;;  %s545_s6 = scalar_lea.vmem %s544_s4, 64 }
  0x43   : > { %v244_v17 = vadd.f32 %v243_v15, %v242_v13  ;;  %v256_v18 = vadd.f32 %v255_v16, %v254_v14  ;;  %p546_p5 = scmp.lt.s32.totalorder %s770_s29, %s544_s4  ;;  %p547_p6 = scmp.lt.s32.totalorder %s545_s6, %s539_s30 }
  0x44   : > { %p542_p2 = pneg %p541_p0 }
  0x45   : > { %v245_v19 = vrot.slane %v244_v17, 4  ;;  %v257_v20 = vrot.slane %v256_v18, 4  ;;  %p548_p4 = por %p547_p6, %p546_p5 }
  0x47   : > { %v246_v21 = vadd.f32 %v245_v19, %v244_v17  ;;  %v258_v22 = vadd.f32 %v257_v20, %v256_v18  ;;  %p549_p7 = pnand %p548_p4, %p542_p2 }
  0x49   : > { %v247_v23 = vrot.slane %v246_v21, 2  ;;  %v259_v24 = vrot.slane %v258_v22, 2 }
  0x4b   : > { %v248_v25 = vadd.f32 %v247_v23, %v246_v21  ;;  %v260_v26 = vadd.f32 %v259_v24, %v258_v22 }
  0x4d   : > { %v249_v27 = vrot.slane %v248_v25, 1  ;;  %v261_v28 = vrot.slane %v260_v26, 1 }
  0x4f   : > { %v250_v29 = vadd.f32 %v249_v27, %v248_v25  ;;  %v262_v30 = vadd.f32 %v261_v28, %v260_v26 }
  0x51   : > { %v251_v31 = vmul.f32 2.0, %v250_v29  ;;  %265 = vst.msk [vmem:[%s223_s27 + $0x1] sm:$0x1] %vm263_vm3, %v262_v30 }
  0x53   : > { %264 = vst.msk [vmem:[%s223_s27] sm:$0x1] %vm263_vm3, %v251_v31 }
  0x54   : > { %552 = shalt.err (!%p549_p7)
}
  0x55   : > { %s553_s20 = scalar_lea.hbm %s279_s15, 32  ;;  %s557_s28 = scalar_lea.hbm %s817_s2, 64 }
  0x56   : > { %p554_p1 = scmp.ne.s32.totalorder %s279_s15, %s553_s20  ;;  %p558_p3 = scmp.lt.s32.totalorder %s279_s15, %s817_s2 }
  0x57   : > { %p559_p8 = scmp.lt.s32.totalorder %s557_s28, %s553_s20 }
  0x58   : > { %p555_p10 = pnand %p554_p1, %p697_p9 }
  0x59   : > { %p560_p0 = por %p559_p8, %p558_p3 }
  0x5a   : > { %p556_p13 = pneg %p555_p10 }
  0x5c   : > { %p561_p12 = pnand %p560_p0, %p556_p13 }
  0x5e   : > { %564 = shalt.err (!%p561_p12)
}
  0x5f   : > { %417 = dma.vmem_to_hbm [thread:$0]  (%p697_p9), %s770_s29, 32, %s279_s15, %s267_s16  }
  0x60 PF: > { %s293_s19 = sand.u32 1, %s603_s9   ;;  %p824_p2 = scmp.ge.s32.totalorder %s623_s14, 2 }
  0x61   : > { %s294_s21 = scalar_lea.sflag [#allocation4], %s293_s19 }
  0x62   : > { %p427_p5 = pnand %p824_p2, %p704_p11 }
  0x64   : > { %p428_p6 = pneg %p427_p5 }
  0x66   : > { %598 = dma.done.wait (%p428_p6), %s294_s21, 32  }
  0x67   : > { %600 = vsyncadd (%p428_p6), %s294_s21, 4294967264  ;;  %s21_s14 = sadd.s32 1, %s623_s14   ;;  %s825_s9 = smov %s607_s10 }
  0x68   : > { %p18_p4 = scmp.ge.s32.totalorder %s21_s14, 4   ;;  %s826_s10 = smov %s611_s11 }
  0x69   : > { %s827_s11 = smov %s702_s23  ;;  %s828_s12 = smov %s619_s13 }
  0x6a   : > { %s829_s13 = smov %s831_s17  ;;  %20 = sbr.rel (!%p18_p4) target bundleno = 8 (0x8), region = 87 }
  0x6f   :  { %299 = vsyncpa [#allocation3], 1 }
  0x70   :  { %301 = vsyncpa [#allocation3 + $0x1], 1 }
  0x71   :  { %302 = vsyncpa [#allocation6], 1 }
  0x72   :  { %304 = vsyncpa [#allocation6 + $0x1], 1 }
  0x73   :  { %305 = vsyncpa [#allocation4], 1 }
  0x74   :  { %307 = vsyncpa [#allocation4 + $0x1], 1 }

</bundles_post_ra>
